<compile_context>
chip_gen: v7x
topology: tpu7x:2x2x1
jax: 0.10.0
libtpu: 0.0.40
codegen_flags: <defaults>
</compile_context>

<pallas_src>
import jax
import jax.numpy as jnp
from jax.experimental import pallas as pl
from jax.experimental.pallas import tpu as pltpu

_LANE = 128


def _round_up(x, m):
    return ((x + m - 1) // m) * m


def _pick_tiles(nc, hw, itemsize, target_block_bytes, g_max=64):
    """Choose (rows, hw_tile, full_row) obeying TPU (8/16, 128) block rules."""
    sub = 8 * max(1, 4 // max(1, itemsize))          # f32 -> 8, bf16 -> 16, int8 -> 32
    padded_hw = _round_up(hw, _LANE)
    # Cap rows so the in-kernel (rows, 128) f32 working set also fits the budget.
    temp_row_cap = max(sub, (target_block_bytes // (4 * _LANE * 4)) // sub * sub)

    full_row = (hw <= g_max * _LANE
                and sub * padded_hw * itemsize <= target_block_bytes)
    if full_row:
        hw_t = hw
        rows = target_block_bytes // (padded_hw * itemsize)   # padded footprint
    else:
        hw_t = (target_block_bytes // (sub * itemsize)) // _LANE * _LANE
        hw_t = max(_LANE, min(hw_t, g_max * _LANE))           # bound fold unroll
        rows = target_block_bytes // (hw_t * itemsize)
    rows = max(sub, (rows // sub) * sub)
    rows = min(rows, temp_row_cap)

    # Clamp to the array; keep >= 2 row blocks when possible so the "parallel"
    # axis shards across both TensorCores on v7x (no effect on v5e/v6e).
    if rows >= nc:
        if nc > sub:
            rows = max(sub, _round_up(-(-nc // 2), sub))
            if rows >= nc:
                rows = nc
        else:
            rows = nc
    return int(rows), int(hw_t), bool(full_row)


def adaptive_concat_pool2d(x, *, target_block_bytes=6 << 20):
    """x: (N, C, H, W) float -> (N, 2*C, 1, 1) matching AdaptiveConcatPool2d."""
    if x.ndim != 4:
        raise ValueError(f"expected NCHW input, got shape {x.shape}")
    if not jnp.issubdtype(x.dtype, jnp.floating):
        # TODO(synk): integer inputs would need an exact (non-f32) max/mean path.
        raise ValueError("adaptive_concat_pool2d supports floating dtypes only")

    N, C, H, W = x.shape
    NC, HW = N * C, H * W
    dtype = x.dtype
    itemsize = dtype.itemsize
    inv_hw = 1.0 / float(HW)

    x2 = x.reshape(NC, HW)
    R, HWT, full_row = _pick_tiles(NC, HW, itemsize, target_block_bytes)

    grid_k = pl.cdiv(HW, HWT)
    k_last = grid_k - 1
    valid_last = HW - k_last * HWT            # valid lanes in the last HW tile
    n_chunks = HWT // _LANE

    # ---------------- Path A: whole HW per block (1-D grid over rows). -------
    def kernel_full(x_ref, out_ref):
        n_full = HW // _LANE
        rem = HW - n_full * _LANE
        pm = None
        ps = None
        for g in range(n_full):                       # VPU fold over 128-lane chunks
            c = x_ref[:, g * _LANE:(g + 1) * _LANE].astype(jnp.float32)
            pm = c if pm is None else jnp.maximum(pm, c)
            ps = c if ps is None else ps + c
        if pm is not None:
            mx = jnp.max(pm, axis=-1, keepdims=True)  # single XLU reduce
            sm = jnp.sum(ps, axis=-1, keepdims=True)
        else:
            mx = None
            sm = None
        if rem:
            t = x_ref[:, n_full * _LANE:HW].astype(jnp.float32)
            tmx = jnp.max(t, axis=-1, keepdims=True)
            tsm = jnp.sum(t, axis=-1, keepdims=True)
            mx = tmx if mx is None else jnp.maximum(mx, tmx)
            sm = tsm if sm is None else sm + tsm
        out_ref[:, 0:1] = mx.astype(out_ref.dtype)
        out_ref[:, 1:2] = (sm * inv_hw).astype(out_ref.dtype)

    # ---------------- Path B: gridded HW reduction (rows x HW tiles). --------
    def kernel_tiled(x_ref, out_ref, max_acc, sum_acc):
        k = pl.program_id(1)

        @pl.when(k == 0)
        def _():
            max_acc[...] = jnp.full_like(max_acc, -jnp.inf)
            sum_acc[...] = jnp.zeros_like(sum_acc)

        def accumulate(valid_lanes):
            # Elementwise (R,128) accumulation on the VPU; mask at most one chunk.
            pm = max_acc[...]
            ps = sum_acc[...]
            for g in range(n_chunks):
                lo = g * _LANE
                if lo >= valid_lanes:                 # fully-padded chunk: skip
                    break
                c = x_ref[:, lo:lo + _LANE].astype(jnp.float32)
                if lo + _LANE > valid_lanes:          # the single partial chunk
                    lane = jax.lax.broadcasted_iota(jnp.int32, c.shape, 1)
                    ok = lane < (valid_lanes - lo)
                    pm = jnp.maximum(pm, jnp.where(ok, c, -jnp.inf))
                    ps = ps + jnp.where(ok, c, 0.0)
                else:
                    pm = jnp.maximum(pm, c)
                    ps = ps + c
            max_acc[...] = pm
            sum_acc[...] = ps

        if valid_last == HWT:                         # HW divides evenly: no masking
            accumulate(HWT)
        else:
            @pl.when(k != k_last)
            def _():
                accumulate(HWT)

            @pl.when(k == k_last)
            def _():
                accumulate(valid_last)

        @pl.when(k == k_last)
        def _():
            mx = jnp.max(max_acc[...], axis=-1, keepdims=True)
            sm = jnp.sum(sum_acc[...], axis=-1, keepdims=True)
            out_ref[:, 0:1] = mx.astype(out_ref.dtype)
            out_ref[:, 1:2] = (sm * inv_hw).astype(out_ref.dtype)

    # ---------------- pallas_call plumbing. -----------------------------------
    out_shape = jax.ShapeDtypeStruct((NC, 2), dtype)
    cost = pl.CostEstimate(
        flops=2 * NC * HW,
        transcendentals=0,
        bytes_accessed=NC * HW * itemsize + 2 * NC * itemsize,
    )

    padded_hwt = _round_up(HWT, _LANE)
    vmem_need = (
        2 * R * padded_hwt * itemsize    # double-buffered input block (lane-padded)
        + 2 * R * _LANE * itemsize       # double-buffered (R, 2) output (lane-padded)
        + 4 * R * _LANE * 4              # f32 accumulators / in-kernel temporaries
    )
    vmem_limit = int(min(max(vmem_need + (4 << 20), 24 << 20), 48 << 20))

    if full_row:
        out = pl.pallas_call(
            kernel_full,
            out_shape=out_shape,
            grid_spec=pltpu.PrefetchScalarGridSpec(
                num_scalar_prefetch=0,
                grid=(pl.cdiv(NC, R),),
                in_specs=[pl.BlockSpec((R, HW), lambda i: (i, 0))],
                out_specs=pl.BlockSpec((R, 2), lambda i: (i, 0)),
            ),
            compiler_params=pltpu.CompilerParams(
                dimension_semantics=("parallel",),
                vmem_limit_bytes=vmem_limit,
            ),
            cost_estimate=cost,
        )(x2)
    else:
        out = pl.pallas_call(
            kernel_tiled,
            out_shape=out_shape,
            grid_spec=pltpu.PrefetchScalarGridSpec(
                num_scalar_prefetch=0,
                grid=(pl.cdiv(NC, R), grid_k),
                in_specs=[pl.BlockSpec((R, HWT), lambda i, k: (i, k))],
                out_specs=pl.BlockSpec((R, 2), lambda i, k: (i, 0)),
                scratch_shapes=[
                    pltpu.VMEM((R, _LANE), jnp.float32),   # running per-lane max
                    pltpu.VMEM((R, _LANE), jnp.float32),   # running per-lane sum
                ],
            ),
            compiler_params=pltpu.CompilerParams(
                dimension_semantics=("parallel", "arbitrary"),
                vmem_limit_bytes=vmem_limit,
            ),
            cost_estimate=cost,
        )(x2)

    mx = out[:, 0].reshape(N, C, 1, 1)
    av = out[:, 1].reshape(N, C, 1, 1)
    # Channel order matches torch.cat([max_pool, avg_pool], dim=1).
    return jnp.concatenate([mx, av], axis=1)


def _reference(x):
    xf = x.astype(jnp.float32)
    mx = jnp.max(xf, axis=(2, 3), keepdims=True)
    av = jnp.mean(xf, axis=(2, 3), keepdims=True)
    return jnp.concatenate([mx, av], axis=1).astype(x.dtype)


if __name__ == "__main__":
    key = jax.random.PRNGKey(0)
    k1, k2, k3, k4 = jax.random.split(key, 4)

    # 1) Small shape consistent with the module: batch=2, channels=4, 16x16.
    x1 = jax.random.normal(k1, (2, 4, 16, 16), dtype=jnp.float32)
    out1 = adaptive_concat_pool2d(x1)
    jax.block_until_ready(out1)
    assert out1.shape == (2, 8, 1, 1), out1.shape
    assert jnp.allclose(out1, _reference(x1), atol=1e-5, rtol=1e-5), "mismatch (case 1)"

    # 2) Odd sizes: non-multiple-of-8 rows (row-block split + padded rows).
    x2 = jax.random.normal(k2, (2, 5, 13, 13), dtype=jnp.float32)
    out2 = adaptive_concat_pool2d(x2)
    jax.block_until_ready(out2)
    assert out2.shape == (2, 10, 1, 1), out2.shape
    assert jnp.allclose(out2, _reference(x2), atol=1e-5, rtol=1e-5), "mismatch (case 2)"

    # 3) Tiny block budget forces the gridded HW reduction (path B) with lane
    #    masking on the last HW tile.
    x3 = jax.random.normal(k3, (1, 3, 40, 37), dtype=jnp.float32)
    out3 = adaptive_concat_pool2d(x3, target_block_bytes=8 * 256 * 4)
    jax.block_until_ready(out3)
    assert out3.shape == (1, 6, 1, 1), out3.shape
    assert jnp.allclose(out3, _reference(x3), atol=1e-5, rtol=1e-5), "mismatch (case 3)"

    # 4) bfloat16 path (16-row sublane tiling, f32 accumulation).
    x4 = jax.random.normal(k4, (2, 16, 8, 8), dtype=jnp.bfloat16)
    out4 = adaptive_concat_pool2d(x4)
    jax.block_until_ready(out4)
    assert out4.shape == (2, 32, 1, 1), out4.shape
    assert jnp.allclose(out4.astype(jnp.float32), _reference(x4).astype(jnp.float32),
                        atol=2e-2, rtol=2e-2), "mismatch (case 4)"

    print("KERNEL_OK")
</pallas_src>

<mosaic_0001>
module attributes {stable_mosaic.version = 11 : i64} {
  func.func @kernel_full(%arg0: i32, %arg1: memref<8x256xf32, #tpu.memory_space<vmem>>, %arg2: memref<8x2xf32, #tpu.memory_space<vmem>>) attributes {dimension_semantics = [#tpu.dimension_semantics<parallel>], iteration_bounds = array<i64: 1>, scalar_prefetch = 0 : i64, scratch_operands = 0 : i64, tpu.core_type = #tpu.core_type<tc>, window_params = [{transform_indices = @transform_0, window_bounds = array<i64: 8, 256>}, {transform_indices = @transform_1, window_bounds = array<i64: 8, 2>}]} {
    %c0 = arith.constant 0 : index
    %c0_0 = arith.constant 0 : index
    %0 = vector.load %arg1[%c0, %c0_0] : memref<8x256xf32, #tpu.memory_space<vmem>>, vector<8x128xf32>
    %c0_1 = arith.constant 0 : index
    %c128 = arith.constant 128 : index
    %1 = vector.load %arg1[%c0_1, %c128] : memref<8x256xf32, #tpu.memory_space<vmem>>, vector<8x128xf32>
    %2 = arith.maximumf %0, %1 : vector<8x128xf32>
    %3 = arith.addf %0, %1 : vector<8x128xf32>
    %cst = arith.constant dense<0xFF800000> : vector<8xf32>
    %4 = vector.multi_reduction <maximumf>, %2, %cst [1] : vector<8x128xf32> to vector<8xf32>
    %5 = vector.shape_cast %4 : vector<8xf32> to vector<8x1xf32>
    %cst_2 = arith.constant dense<0.000000e+00> : vector<8xf32>
    %6 = vector.multi_reduction <add>, %3, %cst_2 [1] : vector<8x128xf32> to vector<8xf32>
    %7 = vector.shape_cast %6 : vector<8xf32> to vector<8x1xf32>
    %c0_3 = arith.constant 0 : index
    %c0_4 = arith.constant 0 : index
    %8 = vector.load %arg2[%c0_3, %c0_4] : memref<8x2xf32, #tpu.memory_space<vmem>>, vector<8x1xf32>
    tpu.vector_store %arg2[%c0_3, %c0_4], %5 {strides = array<i32>} : memref<8x2xf32, #tpu.memory_space<vmem>>, vector<8x1xf32>,
    %cst_5 = arith.constant 3.906250e-03 : f32
    %9 = vector.broadcast %cst_5 : f32 to vector<8x1xf32>
    %10 = arith.mulf %7, %9 : vector<8x1xf32>
    %c0_6 = arith.constant 0 : index
    %c1 = arith.constant 1 : index
    %11 = vector.load %arg2[%c0_6, %c1] : memref<8x2xf32, #tpu.memory_space<vmem>>, vector<8x1xf32>
    tpu.vector_store %arg2[%c0_6, %c1], %10 {strides = array<i32>} : memref<8x2xf32, #tpu.memory_space<vmem>>, vector<8x1xf32>,
    return
  }
  func.func @transform_0(%arg0: i32) -> (i32, i32) {
    %c0_i32 = arith.constant 0 : i32
    %c0_i32_0 = arith.constant 0 : i32
    return %arg0, %c0_i32 : i32, i32
  }
  func.func @transform_1(%arg0: i32) -> (i32, i32) {
    %c0_i32 = arith.constant 0 : i32
    %c0_i32_0 = arith.constant 0 : i32
    return %arg0, %c0_i32 : i32, i32
  }
}

</mosaic_0001>

<bundles_post_ra>
// kernel: tpu_custom_call.1
= control target key start
LH: loop header
LB: loop body
LE: loop exit
PB: predicated region body
PF: predicated region fallthrough
CT: control target
= control target key end

     0   :  { %6 = vsyncpa [#allocation3], 0  ;;  %s63_s6 = smov [#allocation2]   ;;  %s92_s0 = inlined_call_operand.hbm [shape: f32[8,256], index: 0, kind: input, shape index: {}]   ;;  %s93_s1 = inlined_call_operand.vmem [shape: f32[8,2], index: 1, kind: output, shape index: {}]  }
   0x1   :  { %s13_s7 = sshll.u32 %s63_s6, 4  ;;  %s39_s10 = scalar_lea.hbm %s92_s0, 256  ;;  %s14_s7 = int_to_ptr.vmem [resolvable:$true] %s13_s7 }
   0x2   :  { %p40_p0 = scmp.ne.s32.totalorder %s92_s0, %s39_s10  ;;  %p43_p1 = scmp.lt.u32.totalorder %s39_s10, %s92_s0 }
   0x4   :  { %p45_p2 = pnand %p43_p1, %p40_p0 }
   0x6   :  { %48 = shalt.err (!%p45_p2)
}
   0x7   :  { %s49_s15 = scalar_lea.vmem %s14_s7, 256  ;;  %p54_p4 = scmp.lt.s32.totalorder %s14_s7, %s14_s7 }
   0x8   :  { %p50_p3 = scmp.ne.s32.totalorder %s14_s7, %s49_s15  ;;  %p55_p5 = scmp.lt.s32.totalorder %s49_s15, %s49_s15 }
   0xa   :  { %p56_p6 = por %p55_p5, %p54_p4 }
   0xc   :  { %p57_p7 = pnand %p56_p6, %p50_p3 }
   0xe   :  { %60 = shalt.err (!%p57_p7)
}
   0xf   :  { %16 = dma.hbm_to_vmem [thread:$0]  %s92_s0, 256, %s14_s7, [#allocation3]  }
  0x10   :  { %61 = dma.done.wait [#allocation3], 256  }
  0x11   :  { %62 = vsyncadd [#allocation3], 4294967040  ;;  %v20_v0 = vld [vmem:[#allocation2] sm:$0xff]  ;;  %v21_v1 = vld [vmem:[#allocation2 + $0x8] sm:$0xff]  ;;  %vm28_vm0 = vcmask 7168   ;;  %vm31_vm1 = vcmask 15368  }
  0x12   :  { %v23_v2 = vadd.f32 %v21_v1, %v20_v0  ;;  %v22_v3 = vmax.f32 %v20_v0, %v21_v1 }
  0x14   :  { %26 = vadd.xlane.f32.xlu0 %v23_v2 }
  0x18   :  { %24 = vmax.xlane.f32.xlu0 %v22_v3 }
  0xa1   :  { %v27_v4 = vpop.xlane.xlu0 %26 }
  0xa2   :  { %v30_v5 = vmul.f32 0.00390625, %v27_v4 }
  0xa5   :  { %v25_v6 = vpop.xlane.xlu0 %24 }
  0xa6   :  { %29 = vst.msk [vmem:[%s93_s1] sm:$0xff] %vm28_vm0, %v25_v6 }
  0xa7   :  { %32 = vst.msk [vmem:[%s93_s1] sm:$0xff] %vm31_vm1, %v30_v5 }
  0xa8   :  { %37 = vsyncpa [#allocation3], 1 }

</bundles_post_ra>
